<compile_context>
chip_gen: v5e
topology: v5e:2x2
jax: 0.10.0
libtpu: 0.0.40
codegen_flags: <defaults>
</compile_context>

<pallas_src>
import functools

import jax
import jax.numpy as jnp
from jax.experimental import pallas as pl
from jax.experimental.pallas import tpu as pltpu


def _ce_label_smooth_kernel(logits_ref, targets_ref, partial_ref, *,
                            epsilon: float, num_classes: int, n_valid: int,
                            tile_n: int, needs_mask: bool):
    i = pl.program_id(0)

    # (tile_n, C) tile; DMA stays in the input dtype, cast to f32 in-kernel.
    x = logits_ref[...].astype(jnp.float32)
    tn, c = x.shape

    # Row logsumexp.
    row_max = jnp.max(x, axis=1, keepdims=True)                    # (tile_n, 1)
    sum_exp = jnp.sum(jnp.exp(x - row_max), axis=1, keepdims=True)
    lse = row_max + jnp.log(sum_exp)

    # Fused weighted reduction: smoothed-target weights built from a (1, C)
    # class-id row broadcast against the (tile_n, 1) targets.
    class_row = jax.lax.broadcasted_iota(jnp.int32, (1, c), 1)     # (1, C)
    tgt = targets_ref[...]                                         # (tile_n, 1)
    w_on = jnp.float32(1.0 - epsilon + epsilon / num_classes)
    w_off = jnp.float32(epsilon / num_classes)
    weights = jnp.where(class_row == tgt, w_on, w_off)             # (tile_n, C)

    # per-row loss = sum_c w_c * (lse - x_c) = lse - sum_c w_c * x_c
    per_row = lse - jnp.sum(x * weights, axis=1, keepdims=True)    # (tile_n, 1)

    if needs_mask:
        # Zero rows of the ragged trailing block (undefined logits/targets).
        row_ids = i * tile_n + jax.lax.broadcasted_iota(jnp.int32, (tn, 1), 0)
        per_row = jnp.where(row_ids < n_valid, per_row, 0.0)

    partial_ref[0, 0] = jnp.sum(per_row)


def _vmem_budgets():
    """Return (tile byte budget, scoped vmem limit), generation aware."""
    try:
        vmem_cap = int(pltpu.get_tpu_info().vmem_capacity_bytes)
    except Exception:  # unknown runtime -> assume the smaller (v7x) VMEM
        vmem_cap = 64 * 1024 * 1024
    if vmem_cap >= 100 * 1024 * 1024:           # v5e / v6e: 128 MiB physical
        return 48 * 1024 * 1024, 96 * 1024 * 1024
    return 20 * 1024 * 1024, 32 * 1024 * 1024   # v7x: 64 MiB physical


def _pick_tile_n(n: int, c: int, itemsize: int, budget: int) -> int:
    # Size tiles by bytes: double-buffered input tile in its own dtype plus
    # ~3 f32 temporaries per row, with C padded to the 128-lane vreg width.
    c_pad = ((c + 127) // 128) * 128
    per_row_bytes = c_pad * (2 * itemsize + 3 * 4)
    t = budget // max(per_row_bytes, 1)
    t = max(8, (t // 8) * 8)
    n_pad8 = ((n + 7) // 8) * 8
    return min(t, n_pad8)


def cross_entropy_label_smooth(logits, targets, *, num_classes, epsilon,
                               tile_n=None):
    """Pallas equivalent of CrossEntropyLabelSmooth.forward."""
    n, c = logits.shape
    assert c == num_classes
    itemsize = jnp.dtype(logits.dtype).itemsize

    budget, vmem_limit = _vmem_budgets()
    if tile_n is None:
        tile_n = _pick_tile_n(n, c, itemsize, budget)
    assert tile_n % 8 == 0 and tile_n >= 8

    num_tiles = -(-n // tile_n)                  # ceil; no logits padding
    needs_mask = num_tiles * tile_n != n

    targets_2d = targets.astype(jnp.int32).reshape(n, 1)

    kernel = functools.partial(
        _ce_label_smooth_kernel,
        epsilon=float(epsilon),
        num_classes=num_classes,
        n_valid=n,
        tile_n=tile_n,
        needs_mask=needs_mask,
    )

    cost = pl.CostEstimate(
        flops=8 * n * c,
        transcendentals=n * c,
        bytes_accessed=n * c * itemsize + n * 4 + num_tiles * 4,
    )

    partials = pl.pallas_call(
        kernel,
        out_shape=jax.ShapeDtypeStruct((num_tiles, 1), jnp.float32),
        grid=(num_tiles,),
        in_specs=[
            pl.BlockSpec((tile_n, c), lambda i: (i, 0)),   # logits tile
            pl.BlockSpec((tile_n, 1), lambda i: (i, 0)),   # targets tile
        ],
        out_specs=pl.BlockSpec((1, 1), lambda i: (i, 0),
                               memory_space=pltpu.SMEM),   # per-tile partial
        compiler_params=pltpu.CompilerParams(
            dimension_semantics=("parallel",),             # both TCs on v7x
            vmem_limit_bytes=vmem_limit,
        ),
        cost_estimate=cost,
    )(logits, targets_2d)

    # Final reduction (tiny) + mean over the true batch size in the wrapper.
    return jnp.sum(partials) * jnp.float32(1.0 / n)


def _reference(logits, targets, *, num_classes, epsilon):
    # Pure-JAX reference mirroring the PyTorch module exactly.
    x = logits.astype(jnp.float32)
    log_probs = jax.nn.log_softmax(x, axis=1)
    onehot = jax.nn.one_hot(targets, num_classes, dtype=jnp.float32)
    t = (1.0 - epsilon) * onehot + epsilon / num_classes
    return jnp.sum(jnp.mean(-t * log_probs, axis=0))


if __name__ == "__main__":
    epsilon = 0.1
    key = jax.random.PRNGKey(0)

    # (batch, num_classes, forced tile) -- exercises single-tile, multi-tile,
    # and ragged (batch not a multiple of the tile, masked trailing block).
    configs = [
        (8, 10, None),   # single tile, exact fit
        (24, 16, 8),     # 3 tiles, exact fit
        (20, 10, 8),     # 3 tiles with 4 masked rows in the trailing block
    ]

    for batch, num_classes, tile_n in configs:
        key, k_logits, k_targets = jax.random.split(key, 3)
        logits = jax.random.normal(k_logits, (batch, num_classes),
                                   dtype=jnp.float32)
        targets = jax.random.randint(k_targets, (batch,), 0, num_classes,
                                     dtype=jnp.int32)

        loss = cross_entropy_label_smooth(
            logits, targets, num_classes=num_classes, epsilon=epsilon,
            tile_n=tile_n,
        )
        loss = jax.block_until_ready(loss)

        ref = _reference(logits, targets, num_classes=num_classes,
                         epsilon=epsilon)
        assert jnp.allclose(loss, ref, rtol=1e-5, atol=1e-5), (
            batch, num_classes, loss, ref)

    print("KERNEL_OK")
</pallas_src>

<mosaic_0001>
module attributes {stable_mosaic.version = 11 : i64} {
  func.func @_ce_label_smooth_kernel(%arg0: i32, %arg1: memref<8x10xf32, #tpu.memory_space<vmem>>, %arg2: memref<8x1xi32, #tpu.memory_space<vmem>>, %arg3: memref<1x1xf32, #tpu.memory_space<smem>>) attributes {dimension_semantics = [#tpu.dimension_semantics<parallel>], iteration_bounds = array<i64: 1>, scalar_prefetch = 0 : i64, scratch_operands = 0 : i64, tpu.core_type = #tpu.core_type<tc>, window_params = [{transform_indices = @transform_0, window_bounds = array<i64: 8, 10>}, {transform_indices = @transform_1, window_bounds = array<i64: 8, 1>}, {transform_indices = @transform_2, window_bounds = array<i64: 1, 1>}]} {
    %c0 = arith.constant 0 : index
    %c0_0 = arith.constant 0 : index
    %0 = vector.load %arg1[%c0, %c0_0] : memref<8x10xf32, #tpu.memory_space<vmem>>, vector<8x10xf32>
    %cst = arith.constant dense<0xFF800000> : vector<8xf32>
    %1 = vector.multi_reduction <maximumf>, %0, %cst [1] : vector<8x10xf32> to vector<8xf32>
    %2 = vector.shape_cast %1 : vector<8xf32> to vector<8x1xf32>
    %3 = vector.broadcast %2 : vector<8x1xf32> to vector<8x10xf32>
    %4 = arith.subf %0, %3 : vector<8x10xf32>
    %5 = math.exp %4 : vector<8x10xf32>
    %cst_1 = arith.constant dense<0.000000e+00> : vector<8xf32>
    %6 = vector.multi_reduction <add>, %5, %cst_1 [1] : vector<8x10xf32> to vector<8xf32>
    %7 = vector.shape_cast %6 : vector<8xf32> to vector<8x1xf32>
    %8 = math.log %7 : vector<8x1xf32>
    %9 = arith.addf %2, %8 : vector<8x1xf32>
    %10 = tpu.iota {dimensions = array<i32: 1>} : vector<1x10xi32>
    %c0_2 = arith.constant 0 : index
    %c0_3 = arith.constant 0 : index
    %11 = vector.load %arg2[%c0_2, %c0_3] : memref<8x1xi32, #tpu.memory_space<vmem>>, vector<8x1xi32>
    %12 = vector.broadcast %10 : vector<1x10xi32> to vector<8x10xi32>
    %13 = vector.broadcast %11 : vector<8x1xi32> to vector<8x10xi32>
    %14 = arith.cmpi eq, %12, %13 : vector<8x10xi32>
    %cst_4 = arith.constant 9.100000e-01 : f32
    %cst_5 = arith.constant 0.00999999977 : f32
    %15 = vector.broadcast %cst_4 : f32 to vector<8x10xf32>
    %16 = vector.broadcast %cst_5 : f32 to vector<8x10xf32>
    %17 = arith.select %14, %15, %16 : vector<8x10xi1>, vector<8x10xf32>
    %18 = arith.mulf %0, %17 : vector<8x10xf32>
    %cst_6 = arith.constant dense<0.000000e+00> : vector<8xf32>
    %19 = vector.multi_reduction <add>, %18, %cst_6 [1] : vector<8x10xf32> to vector<8xf32>
    %20 = vector.shape_cast %19 : vector<8xf32> to vector<8x1xf32>
    %21 = arith.subf %9, %20 : vector<8x1xf32>
    %22 = vector.shape_cast %21 : vector<8x1xf32> to vector<1x8x1xf32>
    %cst_7 = arith.constant dense<0.000000e+00> : vector<1xf32>
    %23 = vector.multi_reduction <add>, %22, %cst_7 [1, 2] : vector<1x8x1xf32> to vector<1xf32>
    %24 = vector.shape_cast %23 : vector<1xf32> to vector<1x1x1xf32>
    %25 = vector.extract %24[0, 0, 0] : f32 from vector<1x1x1xf32>
    %c0_8 = arith.constant 0 : index
    %c0_9 = arith.constant 0 : index
    %26 = memref.load %arg3[%c0_8, %c0_9] : memref<1x1xf32, #tpu.memory_space<smem>>
    memref.store %25, %arg3[%c0_8, %c0_9] : memref<1x1xf32, #tpu.memory_space<smem>>
    return
  }
  func.func @transform_0(%arg0: i32) -> (i32, i32) {
    %c0_i32 = arith.constant 0 : i32
    %c0_i32_0 = arith.constant 0 : i32
    return %arg0, %c0_i32 : i32, i32
  }
  func.func @transform_1(%arg0: i32) -> (i32, i32) {
    %c0_i32 = arith.constant 0 : i32
    %c0_i32_0 = arith.constant 0 : i32
    return %arg0, %c0_i32 : i32, i32
  }
  func.func @transform_2(%arg0: i32) -> (i32, i32) {
    %c0_i32 = arith.constant 0 : i32
    %c0_i32_0 = arith.constant 0 : i32
    return %arg0, %c0_i32 : i32, i32
  }
}

</mosaic_0001>

<bundles_post_ra>
// kernel: tpu_custom_call.1
= control target key start
LH: loop header
LB: loop body
LE: loop exit
PB: predicated region body
PF: predicated region fallthrough
CT: control target
= control target key end

     0   :  { %vm13_vm0 = vcmask 80896   ;;  %s121_s0 = inlined_call_operand.vmem [shape: f32[8,10], index: 0, kind: input, shape index: {}]   ;;  %s122_s1 = inlined_call_operand.vmem [shape: s32[8,1], index: 1, kind: input, shape index: {}]   ;;  %s123_s2 = inlined_call_operand.hbm [shape: f32[1,1], index: 2, kind: output, shape index: {}]  }
   0x1   :  { %v12_v0 = vld [vmem:[%s121_s0] sm:$0xff] }
   0x2   :  { %7 = vsyncpa [#allocation3], 0  ;;  %v14_v1 = vsel %vm13_vm0, %v12_v0, -inf  ;;  %v91_v2 = vmov 0   ;;  %v28_v3 = vld [vmem:[%s122_s1] sm:$0xff]  ;;  %v26_v9 = vlaneseq  ;;  %vm39_vm2 = vcmask 7168  }
   0x3   :  { %72 = vset.pattern.permute.xlu0 %v91_v2  ;;  %v92_v12 = vmov 0.01   ;;  %s57_s13 = sshll.u32 %s123_s2, 4  ;;  %s93_s15 = smov [#allocation2]   ;;  %s58_s13 = int_to_ptr.hbm [resolvable:$true] %s57_s13 }
   0x4   :  { %15 = vmax.xlane.f32.xlu0 %v14_v1  ;;  %v27_v10 = vand.u32 127, %v26_v9 }
  0x18   :  { %30 = vperm.xlu0 %72, %v28_v3  }
  0x77   :  { %v16_v4 = vpop.xlane.xlu0 %15 }
  0x78   :  { %v17_v5 = vsub.f32 %v12_v0, %v16_v4 }
  0x7a   :  { %v18_v6 = vmul.f32 1.442695, %v17_v5 }
  0x7c   :  { %73 = vpow2.f32 %v18_v6 }
  0x82   :  { %v74_v7 = vpop.eup %73 }
  0x83   :  { %v20_v8 = vsel %vm13_vm0, %v74_v7, 0.0 }
  0x84   :  { %21 = vadd.xlane.f32.xlu1 %v20_v8 }
  0x8a   :  { %v31_v11 = vpop.permute.xlu0 %30 }
  0x8b   :  { %vm32_vm1 = vcmp.eq.s32.totalorder %v27_v10, %v31_v11 }
  0x8c   :  { %v33_v13 = vsel %vm32_vm1, 0.91, %v92_v12 }
  0x8d   :  { %v34_v14 = vmul.f32 %v33_v13, %v12_v0 }
  0x8f   :  { %v35_v15 = vsel %vm13_vm0, %v34_v14, 0.0 }
  0x90   :  { %36 = vadd.xlane.f32.xlu1 %v35_v15 }
  0xf7   :  { %v22_v16 = vpop.xlane.xlu1 %21 }
  0xf8   :  { %75 = vlog2.f32 %v22_v16 }
  0xfe   :  { %v76_v17 = vpop.eup %75 }
  0xff   :  { %v24_v18 = vmul.f32 0.6931472, %v76_v17 }
 0x101   :  { %v25_v19 = vadd.f32 %v24_v18, %v16_v4 }
 0x103   :  { %v37_v20 = vpop.xlane.xlu1 %36 }
 0x104   :  { %v38_v21 = vsub.f32 %v25_v19, %v37_v20 }
 0x106   :  { %v40_v22 = vsel %vm39_vm2, %v38_v21, 0.0 }
 0x107   :  { %41 = vadd.xlane.f32.xlu2 %v40_v22 }
 0x17a   :  { %v42_v23 = vpop.xlane.xlu2 %41 }
 0x17b   :  { %v43_v24 = vrot.slane %v42_v23, 4 }
 0x17d   :  { %v44_v25 = vadd.f32 %v43_v24, %v42_v23 }
 0x17f   :  { %v45_v26 = vrot.slane %v44_v25, 2 }
 0x181   :  { %v46_v27 = vadd.f32 %v45_v26, %v44_v25 }
 0x183   :  { %v47_v28 = vrot.slane %v46_v27, 1 }
 0x185   :  { %v48_v29 = vadd.f32 %v47_v28, %v46_v27 }
 0x187   :  { %67 = vpush %v48_v29 }
 0x1b8   :  { %s68_s14 = spop %67 }
 0x1b9   :  { %51 = sst [smem:[#allocation2]] %s68_s14 }
 0x1ba   :  { %60 = dma.smem_to_hbm %s93_s15, 16, %s58_s13, [#allocation3]  }
 0x1bb   :  { %89 = dma.done.wait [#allocation3], 16  }
 0x1bc   :  { %90 = vsyncadd [#allocation3], 4294967280 }
 0x1bd   :  { %65 = sfence }
 0x1be   :  { %66 = vsyncpa [#allocation3], 1 }

</bundles_post_ra>
